<compile_context>
chip_gen: v5e
topology: v5e:2x2
jax: 0.10.0
libtpu: 0.0.40
codegen_flags: <defaults>
</compile_context>

<pallas_src>
import functools

import jax
import jax.numpy as jnp
from jax.experimental import pallas as pl
from jax.experimental.pallas import tpu as pltpu  # noqa: F401  (kept for TPU-specific tuning hooks)


def _gru_kernel(x_ref,      # (S*B, E)   seq-major flattened embeddings
                wx_ref,     # (E, 3H)    fused [W_z | W_r | W_h]
                bx_ref,     # (1, 3H)    fused (b_wz+b_uz | b_wr+b_ur | b_wh+b_uh)
                uzr_ref,    # (H, 2H)    fused [U_z | U_r]
                uh_ref,     # (H, H)
                wfc_ref,    # (H, O)
                bfc_ref,    # (1, O)
                out_ref,    # (B, O)
                *, seq_len, batch, hidden):
    B, H = batch, hidden

    # --- hoisted input projection: one big MXU matmul for every timestep at once ---
    xw = (jnp.dot(x_ref[...], wx_ref[...], preferred_element_type=jnp.float32)
          + bx_ref[...])                                   # (S*B, 3H)

    uzr = uzr_ref[...]
    uh = uh_ref[...]

    # --- serial recurrence: only the h-dependent matmuls remain on the critical path ---
    h = jnp.zeros((B, H), jnp.float32)
    for t in range(seq_len):                               # statically unrolled (S small)
        xt = xw[t * B:(t + 1) * B, :]                      # (B, 3H), static row slice
        hu = jnp.dot(h, uzr, preferred_element_type=jnp.float32)   # (B, 2H)
        z_t = jax.nn.sigmoid(xt[:, 0:H] + hu[:, 0:H])
        r_t = jax.nn.sigmoid(xt[:, H:2 * H] + hu[:, H:2 * H])
        h_tilde = jnp.tanh(xt[:, 2 * H:3 * H]
                           + jnp.dot(r_t * h, uh, preferred_element_type=jnp.float32))
        h = (1.0 - z_t) * h + z_t * h_tilde

    # --- final fc on the last hidden state ---
    out_ref[...] = (jnp.dot(h, wfc_ref[...], preferred_element_type=jnp.float32)
                    + bfc_ref[...])


@jax.jit
def gru_model_forward(tokens, params):
    """tokens: int32 [batch, seq].  Returns [batch, output_size] float32."""
    emb = jnp.take(params["embedding"], tokens, axis=0)    # (B, S, E) gather (JAX glue)
    B, S, E = emb.shape
    x = jnp.transpose(emb, (1, 0, 2)).reshape(S * B, E)    # seq-major, flattened

    H = params["W_z"].shape[1]
    O = params["W_fc"].shape[1]

    # Fused parameter packing (wrapper-side, done once under jit):
    W_x = jnp.concatenate([params["W_z"], params["W_r"], params["W_h"]], axis=1)   # (E, 3H)
    b_x = jnp.concatenate([params["b_wz"] + params["b_uz"],
                           params["b_wr"] + params["b_ur"],
                           params["b_wh"] + params["b_uh"]], axis=1)                # (1, 3H)
    U_zr = jnp.concatenate([params["U_z"], params["U_r"]], axis=1)                  # (H, 2H)

    kernel = functools.partial(_gru_kernel, seq_len=S, batch=B, hidden=H)

    # Grid-less pallas_call: all operands are tiny and live fully in VMEM; the
    # recurrence runs as one kernel invocation with an unrolled in-kernel loop.
    out = pl.pallas_call(
        kernel,
        out_shape=jax.ShapeDtypeStruct((B, O), jnp.float32),
    )(x, W_x, b_x, U_zr, params["U_h"], params["W_fc"], params["b_fc"])
    return out


def init_params(key, vocab_size, embedding_dim, hidden_size, output_size):
    """Deterministic synthetic parameters (PyTorch-Linear-style uniform init),
    stored pre-transposed as [in, out]; biases as [1, out]."""
    ks = jax.random.split(key, 16)
    ki = iter(ks)

    def linear(in_f, out_f):
        bound = 1.0 / jnp.sqrt(in_f)
        w = jax.random.uniform(next(ki), (in_f, out_f), jnp.float32, -bound, bound)
        b = jax.random.uniform(next(ki), (1, out_f), jnp.float32, -bound, bound)
        return w, b

    params = {}
    params["embedding"] = jax.random.normal(next(ki), (vocab_size, embedding_dim),
                                            jnp.float32)
    params["W_z"], params["b_wz"] = linear(embedding_dim, hidden_size)
    params["U_z"], params["b_uz"] = linear(hidden_size, hidden_size)
    params["W_r"], params["b_wr"] = linear(embedding_dim, hidden_size)
    params["U_r"], params["b_ur"] = linear(hidden_size, hidden_size)
    params["W_h"], params["b_wh"] = linear(embedding_dim, hidden_size)
    params["U_h"], params["b_uh"] = linear(hidden_size, hidden_size)
    params["W_fc"], params["b_fc"] = linear(hidden_size, output_size)
    return params


def reference_forward(tokens, params):
    """Pure-JAX reference of the PyTorch forward (for correctness check)."""
    x = jnp.take(params["embedding"], tokens, axis=0)   # (B, S, E)
    B, S, _ = x.shape
    H = params["W_z"].shape[1]
    h = jnp.zeros((B, H), jnp.float32)
    for t in range(S):
        xt = x[:, t, :]
        z = jax.nn.sigmoid(xt @ params["W_z"] + params["b_wz"]
                           + h @ params["U_z"] + params["b_uz"])
        r = jax.nn.sigmoid(xt @ params["W_r"] + params["b_wr"]
                           + h @ params["U_r"] + params["b_ur"])
        h_tilde = jnp.tanh(xt @ params["W_h"] + params["b_wh"]
                           + (r * h) @ params["U_h"] + params["b_uh"])
        h = (1.0 - z) * h + z * h_tilde
    return h @ params["W_fc"] + params["b_fc"]


if __name__ == "__main__":
    vocab_size, embedding_dim, hidden_size, output_size = 16, 32, 32, 8
    batch, seq_len = 8, 8

    key = jax.random.PRNGKey(0)
    k_tok, k_par = jax.random.split(key)
    tokens = jax.random.randint(k_tok, (batch, seq_len), 0, vocab_size, dtype=jnp.int32)
    params = init_params(k_par, vocab_size, embedding_dim, hidden_size, output_size)

    out = gru_model_forward(tokens, params)
    out = jax.block_until_ready(out)

    ref = reference_forward(tokens, params)
    assert out.shape == (batch, output_size)
    assert jnp.allclose(out, ref, rtol=1e-4, atol=1e-4), "mismatch vs reference"

    print("KERNEL_OK")
</pallas_src>

<mosaic_0001>
module attributes {stable_mosaic.version = 11 : i64} {
  func.func @_gru_kernel(%arg0: memref<64x32xf32, #tpu.memory_space<vmem>>, %arg1: memref<32x96xf32, #tpu.memory_space<vmem>>, %arg2: memref<1x96xf32, #tpu.memory_space<vmem>>, %arg3: memref<32x64xf32, #tpu.memory_space<vmem>>, %arg4: memref<32x32xf32, #tpu.memory_space<vmem>>, %arg5: memref<32x8xf32, #tpu.memory_space<vmem>>, %arg6: memref<1x8xf32, #tpu.memory_space<vmem>>, %arg7: memref<8x8xf32, #tpu.memory_space<vmem>>) attributes {dimension_semantics = [], scalar_prefetch = 0 : i64, scratch_operands = 0 : i64, tpu.core_type = #tpu.core_type<tc>} {
    %c0 = arith.constant 0 : index
    %c0_0 = arith.constant 0 : index
    %0 = vector.load %arg0[%c0, %c0_0] : memref<64x32xf32, #tpu.memory_space<vmem>>, vector<64x32xf32>
    %c0_1 = arith.constant 0 : index
    %c0_2 = arith.constant 0 : index
    %1 = vector.load %arg1[%c0_1, %c0_2] : memref<32x96xf32, #tpu.memory_space<vmem>>, vector<32x96xf32>
    %cst = arith.constant dense<0.000000e+00> : vector<64x96xf32>
    %2 = tpu.matmul %0, %1, %cst {dimension_numbers = #tpu.dot_dimension_numbers<[1], [0], [0], [1], [0, 0, 1, 1], [], []>} : vector<64x32xf32>, vector<32x96xf32>, vector<64x96xf32> -> vector<64x96xf32>
    %c0_3 = arith.constant 0 : index
    %c0_4 = arith.constant 0 : index
    %3 = vector.load %arg2[%c0_3, %c0_4] : memref<1x96xf32, #tpu.memory_space<vmem>>, vector<1x96xf32>
    %4 = vector.broadcast %3 : vector<1x96xf32> to vector<64x96xf32>
    %5 = arith.addf %2, %4 : vector<64x96xf32>
    %c0_5 = arith.constant 0 : index
    %c0_6 = arith.constant 0 : index
    %6 = vector.load %arg3[%c0_5, %c0_6] : memref<32x64xf32, #tpu.memory_space<vmem>>, vector<32x64xf32>
    %c0_7 = arith.constant 0 : index
    %c0_8 = arith.constant 0 : index
    %7 = vector.load %arg4[%c0_7, %c0_8] : memref<32x32xf32, #tpu.memory_space<vmem>>, vector<32x32xf32>
    %cst_9 = arith.constant 0.000000e+00 : f32
    %8 = vector.broadcast %cst_9 : f32 to vector<8x32xf32>
    %9 = vector.extract_strided_slice %5 {offsets = [0, 0], sizes = [8, 96], strides = [1, 1]} : vector<64x96xf32> to vector<8x96xf32>
    %cst_10 = arith.constant dense<0.000000e+00> : vector<8x64xf32>
    %10 = tpu.matmul %8, %6, %cst_10 {dimension_numbers = #tpu.dot_dimension_numbers<[1], [0], [0], [1], [0, 0, 1, 1], [], []>} : vector<8x32xf32>, vector<32x64xf32>, vector<8x64xf32> -> vector<8x64xf32>
    %11 = vector.extract_strided_slice %9 {offsets = [0, 0], sizes = [8, 32], strides = [1, 1]} : vector<8x96xf32> to vector<8x32xf32>
    %12 = vector.extract_strided_slice %10 {offsets = [0, 0], sizes = [8, 32], strides = [1, 1]} : vector<8x64xf32> to vector<8x32xf32>
    %13 = arith.addf %11, %12 : vector<8x32xf32>
    %14 = arith.negf %13 : vector<8x32xf32>
    %15 = math.exp %14 : vector<8x32xf32>
    %cst_11 = arith.constant 1.000000e+00 : f32
    %16 = vector.broadcast %cst_11 : f32 to vector<8x32xf32>
    %17 = arith.addf %16, %15 : vector<8x32xf32>
    %18 = arith.divf %16, %17 : vector<8x32xf32>
    %19 = vector.extract_strided_slice %9 {offsets = [0, 32], sizes = [8, 32], strides = [1, 1]} : vector<8x96xf32> to vector<8x32xf32>
    %20 = vector.extract_strided_slice %10 {offsets = [0, 32], sizes = [8, 32], strides = [1, 1]} : vector<8x64xf32> to vector<8x32xf32>
    %21 = arith.addf %19, %20 : vector<8x32xf32>
    %22 = arith.negf %21 : vector<8x32xf32>
    %23 = math.exp %22 : vector<8x32xf32>
    %cst_12 = arith.constant 1.000000e+00 : f32
    %24 = vector.broadcast %cst_12 : f32 to vector<8x32xf32>
    %25 = arith.addf %24, %23 : vector<8x32xf32>
    %26 = arith.divf %24, %25 : vector<8x32xf32>
    %27 = vector.extract_strided_slice %9 {offsets = [0, 64], sizes = [8, 32], strides = [1, 1]} : vector<8x96xf32> to vector<8x32xf32>
    %28 = arith.mulf %26, %8 : vector<8x32xf32>
    %cst_13 = arith.constant dense<0.000000e+00> : vector<8x32xf32>
    %29 = tpu.matmul %28, %7, %cst_13 {dimension_numbers = #tpu.dot_dimension_numbers<[1], [0], [0], [1], [0, 0, 1, 1], [], []>} : vector<8x32xf32>, vector<32x32xf32>, vector<8x32xf32> -> vector<8x32xf32>
    %30 = arith.addf %27, %29 : vector<8x32xf32>
    %31 = math.tanh %30 : vector<8x32xf32>
    %cst_14 = arith.constant 1.000000e+00 : f32
    %32 = vector.broadcast %cst_14 : f32 to vector<8x32xf32>
    %33 = arith.subf %32, %18 : vector<8x32xf32>
    %34 = arith.mulf %33, %8 : vector<8x32xf32>
    %35 = arith.mulf %18, %31 : vector<8x32xf32>
    %36 = arith.addf %34, %35 : vector<8x32xf32>
    %37 = vector.extract_strided_slice %5 {offsets = [8, 0], sizes = [8, 96], strides = [1, 1]} : vector<64x96xf32> to vector<8x96xf32>
    %cst_15 = arith.constant dense<0.000000e+00> : vector<8x64xf32>
    %38 = tpu.matmul %36, %6, %cst_15 {dimension_numbers = #tpu.dot_dimension_numbers<[1], [0], [0], [1], [0, 0, 1, 1], [], []>} : vector<8x32xf32>, vector<32x64xf32>, vector<8x64xf32> -> vector<8x64xf32>
    %39 = vector.extract_strided_slice %37 {offsets = [0, 0], sizes = [8, 32], strides = [1, 1]} : vector<8x96xf32> to vector<8x32xf32>
    %40 = vector.extract_strided_slice %38 {offsets = [0, 0], sizes = [8, 32], strides = [1, 1]} : vector<8x64xf32> to vector<8x32xf32>
    %41 = arith.addf %39, %40 : vector<8x32xf32>
    %42 = arith.negf %41 : vector<8x32xf32>
    %43 = math.exp %42 : vector<8x32xf32>
    %cst_16 = arith.constant 1.000000e+00 : f32
    %44 = vector.broadcast %cst_16 : f32 to vector<8x32xf32>
    %45 = arith.addf %44, %43 : vector<8x32xf32>
    %46 = arith.divf %44, %45 : vector<8x32xf32>
    %47 = vector.extract_strided_slice %37 {offsets = [0, 32], sizes = [8, 32], strides = [1, 1]} : vector<8x96xf32> to vector<8x32xf32>
    %48 = vector.extract_strided_slice %38 {offsets = [0, 32], sizes = [8, 32], strides = [1, 1]} : vector<8x64xf32> to vector<8x32xf32>
    %49 = arith.addf %47, %48 : vector<8x32xf32>
    %50 = arith.negf %49 : vector<8x32xf32>
    %51 = math.exp %50 : vector<8x32xf32>
    %cst_17 = arith.constant 1.000000e+00 : f32
    %52 = vector.broadcast %cst_17 : f32 to vector<8x32xf32>
    %53 = arith.addf %52, %51 : vector<8x32xf32>
    %54 = arith.divf %52, %53 : vector<8x32xf32>
    %55 = vector.extract_strided_slice %37 {offsets = [0, 64], sizes = [8, 32], strides = [1, 1]} : vector<8x96xf32> to vector<8x32xf32>
    %56 = arith.mulf %54, %36 : vector<8x32xf32>
    %cst_18 = arith.constant dense<0.000000e+00> : vector<8x32xf32>
    %57 = tpu.matmul %56, %7, %cst_18 {dimension_numbers = #tpu.dot_dimension_numbers<[1], [0], [0], [1], [0, 0, 1, 1], [], []>} : vector<8x32xf32>, vector<32x32xf32>, vector<8x32xf32> -> vector<8x32xf32>
    %58 = arith.addf %55, %57 : vector<8x32xf32>
    %59 = math.tanh %58 : vector<8x32xf32>
    %cst_19 = arith.constant 1.000000e+00 : f32
    %60 = vector.broadcast %cst_19 : f32 to vector<8x32xf32>
    %61 = arith.subf %60, %46 : vector<8x32xf32>
    %62 = arith.mulf %61, %36 : vector<8x32xf32>
    %63 = arith.mulf %46, %59 : vector<8x32xf32>
    %64 = arith.addf %62, %63 : vector<8x32xf32>
    %65 = vector.extract_strided_slice %5 {offsets = [16, 0], sizes = [8, 96], strides = [1, 1]} : vector<64x96xf32> to vector<8x96xf32>
    %cst_20 = arith.constant dense<0.000000e+00> : vector<8x64xf32>
    %66 = tpu.matmul %64, %6, %cst_20 {dimension_numbers = #tpu.dot_dimension_numbers<[1], [0], [0], [1], [0, 0, 1, 1], [], []>} : vector<8x32xf32>, vector<32x64xf32>, vector<8x64xf32> -> vector<8x64xf32>
    %67 = vector.extract_strided_slice %65 {offsets = [0, 0], sizes = [8, 32], strides = [1, 1]} : vector<8x96xf32> to vector<8x32xf32>
    %68 = vector.extract_strided_slice %66 {offsets = [0, 0], sizes = [8, 32], strides = [1, 1]} : vector<8x64xf32> to vector<8x32xf32>
    %69 = arith.addf %67, %68 : vector<8x32xf32>
    %70 = arith.negf %69 : vector<8x32xf32>
    %71 = math.exp %70 : vector<8x32xf32>
    %cst_21 = arith.constant 1.000000e+00 : f32
    %72 = vector.broadcast %cst_21 : f32 to vector<8x32xf32>
    %73 = arith.addf %72, %71 : vector<8x32xf32>
    %74 = arith.divf %72, %73 : vector<8x32xf32>
    %75 = vector.extract_strided_slice %65 {offsets = [0, 32], sizes = [8, 32], strides = [1, 1]} : vector<8x96xf32> to vector<8x32xf32>
    %76 = vector.extract_strided_slice %66 {offsets = [0, 32], sizes = [8, 32], strides = [1, 1]} : vector<8x64xf32> to vector<8x32xf32>
    %77 = arith.addf %75, %76 : vector<8x32xf32>
    %78 = arith.negf %77 : vector<8x32xf32>
    %79 = math.exp %78 : vector<8x32xf32>
    %cst_22 = arith.constant 1.000000e+00 : f32
    %80 = vector.broadcast %cst_22 : f32 to vector<8x32xf32>
    %81 = arith.addf %80, %79 : vector<8x32xf32>
    %82 = arith.divf %80, %81 : vector<8x32xf32>
    %83 = vector.extract_strided_slice %65 {offsets = [0, 64], sizes = [8, 32], strides = [1, 1]} : vector<8x96xf32> to vector<8x32xf32>
    %84 = arith.mulf %82, %64 : vector<8x32xf32>
    %cst_23 = arith.constant dense<0.000000e+00> : vector<8x32xf32>
    %85 = tpu.matmul %84, %7, %cst_23 {dimension_numbers = #tpu.dot_dimension_numbers<[1], [0], [0], [1], [0, 0, 1, 1], [], []>} : vector<8x32xf32>, vector<32x32xf32>, vector<8x32xf32> -> vector<8x32xf32>
    %86 = arith.addf %83, %85 : vector<8x32xf32>
    %87 = math.tanh %86 : vector<8x32xf32>
    %cst_24 = arith.constant 1.000000e+00 : f32
    %88 = vector.broadcast %cst_24 : f32 to vector<8x32xf32>
    %89 = arith.subf %88, %74 : vector<8x32xf32>
    %90 = arith.mulf %89, %64 : vector<8x32xf32>
    %91 = arith.mulf %74, %87 : vector<8x32xf32>
    %92 = arith.addf %90, %91 : vector<8x32xf32>
    %93 = vector.extract_strided_slice %5 {offsets = [24, 0], sizes = [8, 96], strides = [1, 1]} : vector<64x96xf32> to vector<8x96xf32>
    %cst_25 = arith.constant dense<0.000000e+00> : vector<8x64xf32>
    %94 = tpu.matmul %92, %6, %cst_25 {dimension_numbers = #tpu.dot_dimension_numbers<[1], [0], [0], [1], [0, 0, 1, 1], [], []>} : vector<8x32xf32>, vector<32x64xf32>, vector<8x64xf32> -> vector<8x64xf32>
    %95 = vector.extract_strided_slice %93 {offsets = [0, 0], sizes = [8, 32], strides = [1, 1]} : vector<8x96xf32> to vector<8x32xf32>
    %96 = vector.extract_strided_slice %94 {offsets = [0, 0], sizes = [8, 32], strides = [1, 1]} : vector<8x64xf32> to vector<8x32xf32>
    %97 = arith.addf %95, %96 : vector<8x32xf32>
    %98 = arith.negf %97 : vector<8x32xf32>
    %99 = math.exp %98 : vector<8x32xf32>
    %cst_26 = arith.constant 1.000000e+00 : f32
    %100 = vector.broadcast %cst_26 : f32 to vector<8x32xf32>
    %101 = arith.addf %100, %99 : vector<8x32xf32>
    %102 = arith.divf %100, %101 : vector<8x32xf32>
    %103 = vector.extract_strided_slice %93 {offsets = [0, 32], sizes = [8, 32], strides = [1, 1]} : vector<8x96xf32> to vector<8x32xf32>
    %104 = vector.extract_strided_slice %94 {offsets = [0, 32], sizes = [8, 32], strides = [1, 1]} : vector<8x64xf32> to vector<8x32xf32>
    %105 = arith.addf %103, %104 : vector<8x32xf32>
    %106 = arith.negf %105 : vector<8x32xf32>
    %107 = math.exp %106 : vector<8x32xf32>
    %cst_27 = arith.constant 1.000000e+00 : f32
    %108 = vector.broadcast %cst_27 : f32 to vector<8x32xf32>
    %109 = arith.addf %108, %107 : vector<8x32xf32>
    %110 = arith.divf %108, %109 : vector<8x32xf32>
    %111 = vector.extract_strided_slice %93 {offsets = [0, 64], sizes = [8, 32], strides = [1, 1]} : vector<8x96xf32> to vector<8x32xf32>
    %112 = arith.mulf %110, %92 : vector<8x32xf32>
    %cst_28 = arith.constant dense<0.000000e+00> : vector<8x32xf32>
    %113 = tpu.matmul %112, %7, %cst_28 {dimension_numbers = #tpu.dot_dimension_numbers<[1], [0], [0], [1], [0, 0, 1, 1], [], []>} : vector<8x32xf32>, vector<32x32xf32>, vector<8x32xf32> -> vector<8x32xf32>
    %114 = arith.addf %111, %113 : vector<8x32xf32>
    %115 = math.tanh %114 : vector<8x32xf32>
    %cst_29 = arith.constant 1.000000e+00 : f32
    %116 = vector.broadcast %cst_29 : f32 to vector<8x32xf32>
    %117 = arith.subf %116, %102 : vector<8x32xf32>
    %118 = arith.mulf %117, %92 : vector<8x32xf32>
    %119 = arith.mulf %102, %115 : vector<8x32xf32>
    %120 = arith.addf %118, %119 : vector<8x32xf32>
    %121 = vector.extract_strided_slice %5 {offsets = [32, 0], sizes = [8, 96], strides = [1, 1]} : vector<64x96xf32> to vector<8x96xf32>
    %cst_30 = arith.constant dense<0.000000e+00> : vector<8x64xf32>
    %122 = tpu.matmul %120, %6, %cst_30 {dimension_numbers = #tpu.dot_dimension_numbers<[1], [0], [0], [1], [0, 0, 1, 1], [], []>} : vector<8x32xf32>, vector<32x64xf32>, vector<8x64xf32> -> vector<8x64xf32>
    %123 = vector.extract_strided_slice %121 {offsets = [0, 0], sizes = [8, 32], strides = [1, 1]} : vector<8x96xf32> to vector<8x32xf32>
    %124 = vector.extract_strided_slice %122 {offsets = [0, 0], sizes = [8, 32], strides = [1, 1]} : vector<8x64xf32> to vector<8x32xf32>
    %125 = arith.addf %123, %124 : vector<8x32xf32>
    %126 = arith.negf %125 : vector<8x32xf32>
    %127 = math.exp %126 : vector<8x32xf32>
    %cst_31 = arith.constant 1.000000e+00 : f32
    %128 = vector.broadcast %cst_31 : f32 to vector<8x32xf32>
    %129 = arith.addf %128, %127 : vector<8x32xf32>
    %130 = arith.divf %128, %129 : vector<8x32xf32>
    %131 = vector.extract_strided_slice %121 {offsets = [0, 32], sizes = [8, 32], strides = [1, 1]} : vector<8x96xf32> to vector<8x32xf32>
    %132 = vector.extract_strided_slice %122 {offsets = [0, 32], sizes = [8, 32], strides = [1, 1]} : vector<8x64xf32> to vector<8x32xf32>
    %133 = arith.addf %131, %132 : vector<8x32xf32>
    %134 = arith.negf %133 : vector<8x32xf32>
    %135 = math.exp %134 : vector<8x32xf32>
    %cst_32 = arith.constant 1.000000e+00 : f32
    %136 = vector.broadcast %cst_32 : f32 to vector<8x32xf32>
    %137 = arith.addf %136, %135 : vector<8x32xf32>
    %138 = arith.divf %136, %137 : vector<8x32xf32>
    %139 = vector.extract_strided_slice %121 {offsets = [0, 64], sizes = [8, 32], strides = [1, 1]} : vector<8x96xf32> to vector<8x32xf32>
    %140 = arith.mulf %138, %120 : vector<8x32xf32>
    %cst_33 = arith.constant dense<0.000000e+00> : vector<8x32xf32>
    %141 = tpu.matmul %140, %7, %cst_33 {dimension_numbers = #tpu.dot_dimension_numbers<[1], [0], [0], [1], [0, 0, 1, 1], [], []>} : vector<8x32xf32>, vector<32x32xf32>, vector<8x32xf32> -> vector<8x32xf32>
    %142 = arith.addf %139, %141 : vector<8x32xf32>
    %143 = math.tanh %142 : vector<8x32xf32>
    %cst_34 = arith.constant 1.000000e+00 : f32
    %144 = vector.broadcast %cst_34 : f32 to vector<8x32xf32>
    %145 = arith.subf %144, %130 : vector<8x32xf32>
    %146 = arith.mulf %145, %120 : vector<8x32xf32>
    %147 = arith.mulf %130, %143 : vector<8x32xf32>
    %148 = arith.addf %146, %147 : vector<8x32xf32>
    %149 = vector.extract_strided_slice %5 {offsets = [40, 0], sizes = [8, 96], strides = [1, 1]} : vector<64x96xf32> to vector<8x96xf32>
    %cst_35 = arith.constant dense<0.000000e+00> : vector<8x64xf32>
    %150 = tpu.matmul %148, %6, %cst_35 {dimension_numbers = #tpu.dot_dimension_numbers<[1], [0], [0], [1], [0, 0, 1, 1], [], []>} : vector<8x32xf32>, vector<32x64xf32>, vector<8x64xf32> -> vector<8x64xf32>
    %151 = vector.extract_strided_slice %149 {offsets = [0, 0], sizes = [8, 32], strides = [1, 1]} : vector<8x96xf32> to vector<8x32xf32>
    %152 = vector.extract_strided_slice %150 {offsets = [0, 0], sizes = [8, 32], strides = [1, 1]} : vector<8x64xf32> to vector<8x32xf32>
    %153 = arith.addf %151, %152 : vector<8x32xf32>
    %154 = arith.negf %153 : vector<8x32xf32>
    %155 = math.exp %154 : vector<8x32xf32>
    %cst_36 = arith.constant 1.000000e+00 : f32
    %156 = vector.broadcast %cst_36 : f32 to vector<8x32xf32>
    %157 = arith.addf %156, %155 : vector<8x32xf32>
    %158 = arith.divf %156, %157 : vector<8x32xf32>
    %159 = vector.extract_strided_slice %149 {offsets = [0, 32], sizes = [8, 32], strides = [1, 1]} : vector<8x96xf32> to vector<8x32xf32>
    %160 = vector.extract_strided_slice %150 {offsets = [0, 32], sizes = [8, 32], strides = [1, 1]} : vector<8x64xf32> to vector<8x32xf32>
    %161 = arith.addf %159, %160 : vector<8x32xf32>
    %162 = arith.negf %161 : vector<8x32xf32>
    %163 = math.exp %162 : vector<8x32xf32>
    %cst_37 = arith.constant 1.000000e+00 : f32
    %164 = vector.broadcast %cst_37 : f32 to vector<8x32xf32>
    %165 = arith.addf %164, %163 : vector<8x32xf32>
    %166 = arith.divf %164, %165 : vector<8x32xf32>
    %167 = vector.extract_strided_slice %149 {offsets = [0, 64], sizes = [8, 32], strides = [1, 1]} : vector<8x96xf32> to vector<8x32xf32>
    %168 = arith.mulf %166, %148 : vector<8x32xf32>
    %cst_38 = arith.constant dense<0.000000e+00> : vector<8x32xf32>
    %169 = tpu.matmul %168, %7, %cst_38 {dimension_numbers = #tpu.dot_dimension_numbers<[1], [0], [0], [1], [0, 0, 1, 1], [], []>} : vector<8x32xf32>, vector<32x32xf32>, vector<8x32xf32> -> vector<8x32xf32>
    %170 = arith.addf %167, %169 : vector<8x32xf32>
    %171 = math.tanh %170 : vector<8x32xf32>
    %cst_39 = arith.constant 1.000000e+00 : f32
    %172 = vector.broadcast %cst_39 : f32 to vector<8x32xf32>
    %173 = arith.subf %172, %158 : vector<8x32xf32>
    %174 = arith.mulf %173, %148 : vector<8x32xf32>
    %175 = arith.mulf %158, %171 : vector<8x32xf32>
    %176 = arith.addf %174, %175 : vector<8x32xf32>
    %177 = vector.extract_strided_slice %5 {offsets = [48, 0], sizes = [8, 96], strides = [1, 1]} : vector<64x96xf32> to vector<8x96xf32>
    %cst_40 = arith.constant dense<0.000000e+00> : vector<8x64xf32>
    %178 = tpu.matmul %176, %6, %cst_40 {dimension_numbers = #tpu.dot_dimension_numbers<[1], [0], [0], [1], [0, 0, 1, 1], [], []>} : vector<8x32xf32>, vector<32x64xf32>, vector<8x64xf32> -> vector<8x64xf32>
    %179 = vector.extract_strided_slice %177 {offsets = [0, 0], sizes = [8, 32], strides = [1, 1]} : vector<8x96xf32> to vector<8x32xf32>
    %180 = vector.extract_strided_slice %178 {offsets = [0, 0], sizes = [8, 32], strides = [1, 1]} : vector<8x64xf32> to vector<8x32xf32>
    %181 = arith.addf %179, %180 : vector<8x32xf32>
    %182 = arith.negf %181 : vector<8x32xf32>
    %183 = math.exp %182 : vector<8x32xf32>
    %cst_41 = arith.constant 1.000000e+00 : f32
    %184 = vector.broadcast %cst_41 : f32 to vector<8x32xf32>
    %185 = arith.addf %184, %183 : vector<8x32xf32>
    %186 = arith.divf %184, %185 : vector<8x32xf32>
    %187 = vector.extract_strided_slice %177 {offsets = [0, 32], sizes = [8, 32], strides = [1, 1]} : vector<8x96xf32> to vector<8x32xf32>
    %188 = vector.extract_strided_slice %178 {offsets = [0, 32], sizes = [8, 32], strides = [1, 1]} : vector<8x64xf32> to vector<8x32xf32>
    %189 = arith.addf %187, %188 : vector<8x32xf32>
    %190 = arith.negf %189 : vector<8x32xf32>
    %191 = math.exp %190 : vector<8x32xf32>
    %cst_42 = arith.constant 1.000000e+00 : f32
    %192 = vector.broadcast %cst_42 : f32 to vector<8x32xf32>
    %193 = arith.addf %192, %191 : vector<8x32xf32>
    %194 = arith.divf %192, %193 : vector<8x32xf32>
    %195 = vector.extract_strided_slice %177 {offsets = [0, 64], sizes = [8, 32], strides = [1, 1]} : vector<8x96xf32> to vector<8x32xf32>
    %196 = arith.mulf %194, %176 : vector<8x32xf32>
    %cst_43 = arith.constant dense<0.000000e+00> : vector<8x32xf32>
    %197 = tpu.matmul %196, %7, %cst_43 {dimension_numbers = #tpu.dot_dimension_numbers<[1], [0], [0], [1], [0, 0, 1, 1], [], []>} : vector<8x32xf32>, vector<32x32xf32>, vector<8x32xf32> -> vector<8x32xf32>
    %198 = arith.addf %195, %197 : vector<8x32xf32>
    %199 = math.tanh %198 : vector<8x32xf32>
    %cst_44 = arith.constant 1.000000e+00 : f32
    %200 = vector.broadcast %cst_44 : f32 to vector<8x32xf32>
    %201 = arith.subf %200, %186 : vector<8x32xf32>
    %202 = arith.mulf %201, %176 : vector<8x32xf32>
    %203 = arith.mulf %186, %199 : vector<8x32xf32>
    %204 = arith.addf %202, %203 : vector<8x32xf32>
    %205 = vector.extract_strided_slice %5 {offsets = [56, 0], sizes = [8, 96], strides = [1, 1]} : vector<64x96xf32> to vector<8x96xf32>
    %cst_45 = arith.constant dense<0.000000e+00> : vector<8x64xf32>
    %206 = tpu.matmul %204, %6, %cst_45 {dimension_numbers = #tpu.dot_dimension_numbers<[1], [0], [0], [1], [0, 0, 1, 1], [], []>} : vector<8x32xf32>, vector<32x64xf32>, vector<8x64xf32> -> vector<8x64xf32>
    %207 = vector.extract_strided_slice %205 {offsets = [0, 0], sizes = [8, 32], strides = [1, 1]} : vector<8x96xf32> to vector<8x32xf32>
    %208 = vector.extract_strided_slice %206 {offsets = [0, 0], sizes = [8, 32], strides = [1, 1]} : vector<8x64xf32> to vector<8x32xf32>
    %209 = arith.addf %207, %208 : vector<8x32xf32>
    %210 = arith.negf %209 : vector<8x32xf32>
    %211 = math.exp %210 : vector<8x32xf32>
    %cst_46 = arith.constant 1.000000e+00 : f32
    %212 = vector.broadcast %cst_46 : f32 to vector<8x32xf32>
    %213 = arith.addf %212, %211 : vector<8x32xf32>
    %214 = arith.divf %212, %213 : vector<8x32xf32>
    %215 = vector.extract_strided_slice %205 {offsets = [0, 32], sizes = [8, 32], strides = [1, 1]} : vector<8x96xf32> to vector<8x32xf32>
    %216 = vector.extract_strided_slice %206 {offsets = [0, 32], sizes = [8, 32], strides = [1, 1]} : vector<8x64xf32> to vector<8x32xf32>
    %217 = arith.addf %215, %216 : vector<8x32xf32>
    %218 = arith.negf %217 : vector<8x32xf32>
    %219 = math.exp %218 : vector<8x32xf32>
    %cst_47 = arith.constant 1.000000e+00 : f32
    %220 = vector.broadcast %cst_47 : f32 to vector<8x32xf32>
    %221 = arith.addf %220, %219 : vector<8x32xf32>
    %222 = arith.divf %220, %221 : vector<8x32xf32>
    %223 = vector.extract_strided_slice %205 {offsets = [0, 64], sizes = [8, 32], strides = [1, 1]} : vector<8x96xf32> to vector<8x32xf32>
    %224 = arith.mulf %222, %204 : vector<8x32xf32>
    %cst_48 = arith.constant dense<0.000000e+00> : vector<8x32xf32>
    %225 = tpu.matmul %224, %7, %cst_48 {dimension_numbers = #tpu.dot_dimension_numbers<[1], [0], [0], [1], [0, 0, 1, 1], [], []>} : vector<8x32xf32>, vector<32x32xf32>, vector<8x32xf32> -> vector<8x32xf32>
    %226 = arith.addf %223, %225 : vector<8x32xf32>
    %227 = math.tanh %226 : vector<8x32xf32>
    %cst_49 = arith.constant 1.000000e+00 : f32
    %228 = vector.broadcast %cst_49 : f32 to vector<8x32xf32>
    %229 = arith.subf %228, %214 : vector<8x32xf32>
    %230 = arith.mulf %229, %204 : vector<8x32xf32>
    %231 = arith.mulf %214, %227 : vector<8x32xf32>
    %232 = arith.addf %230, %231 : vector<8x32xf32>
    %c0_50 = arith.constant 0 : index
    %c0_51 = arith.constant 0 : index
    %233 = vector.load %arg5[%c0_50, %c0_51] : memref<32x8xf32, #tpu.memory_space<vmem>>, vector<32x8xf32>
    %cst_52 = arith.constant dense<0.000000e+00> : vector<8x8xf32>
    %234 = tpu.matmul %232, %233, %cst_52 {dimension_numbers = #tpu.dot_dimension_numbers<[1], [0], [0], [1], [0, 0, 1, 1], [], []>} : vector<8x32xf32>, vector<32x8xf32>, vector<8x8xf32> -> vector<8x8xf32>
    %c0_53 = arith.constant 0 : index
    %c0_54 = arith.constant 0 : index
    %235 = vector.load %arg6[%c0_53, %c0_54] : memref<1x8xf32, #tpu.memory_space<vmem>>, vector<1x8xf32>
    %236 = vector.broadcast %235 : vector<1x8xf32> to vector<8x8xf32>
    %237 = arith.addf %234, %236 : vector<8x8xf32>
    %c0_55 = arith.constant 0 : index
    %c0_56 = arith.constant 0 : index
    %238 = vector.load %arg7[%c0_55, %c0_56] : memref<8x8xf32, #tpu.memory_space<vmem>>, vector<8x8xf32>
    tpu.vector_store %arg7[%c0_55, %c0_56], %237 {strides = array<i32>} : memref<8x8xf32, #tpu.memory_space<vmem>>, vector<8x8xf32>,
    return
  }
}

</mosaic_0001>

<bundles_post_ra>
// kernel: gru_model_forward.1
= control target key start
LH: loop header
LB: loop body
LE: loop exit
PB: predicated region body
PF: predicated region fallthrough
CT: control target
= control target key end

     0   :  { %s1242_s0 = inlined_call_operand.vmem [shape: f32[64,32], index: 0, kind: input, shape index: {}]   ;;  %s1243_s1 = inlined_call_operand.vmem [shape: f32[32,96], index: 1, kind: input, shape index: {}]   ;;  %s1244_s2 = inlined_call_operand.vmem [shape: f32[1,96], index: 2, kind: input, shape index: {}]   ;;  %s1245_s3 = inlined_call_operand.vmem [shape: f32[32,64], index: 3, kind: input, shape index: {}]   ;;  %s1246_s4 = inlined_call_operand.vmem [shape: f32[32,32], index: 4, kind: input, shape index: {}]   ;;  %s1247_s5 = inlined_call_operand.vmem [shape: f32[32,8], index: 5, kind: input, shape index: {}]   ;;  %s1248_s6 = inlined_call_operand.vmem [shape: f32[1,8], index: 6, kind: input, shape index: {}]   ;;  %s1249_s7 = inlined_call_operand.hbm [shape: f32[8,8], index: 7, kind: output, shape index: {}]  }
   0x1   :  { %v38_v0 = vld [vmem:[%s1243_s1 + $0x18] sm:$0xff]  ;;  %v37_v1 = vld [vmem:[%s1243_s1 + $0x10] sm:$0xff]  ;;  %v36_v4 = vld [vmem:[%s1243_s1 + $0x8] sm:$0xff] }
   0x2   :  { %v1022_v2 = vld [vmem:[%s1245_s3 + $0x18] sm:$0xff]  ;;  %80 = vmatpush.msra.mxu0 %v38_v0  ;;  %v1028_v3 = vld [vmem:[%s1245_s3 + $0x10] sm:$0xff]  ;;  %v1036_v5 = vld [vmem:[%s1245_s3 + $0x8] sm:$0xff]  ;;  %883 = vmatpush.msra.mxu3 %v38_v0 }
   0x3   :  { %132 = vmatpush.msra.mxu1 %v1022_v2  ;;  %v35_v6 = vld [vmem:[%s1243_s1] sm:$0xff] }
   0x4   :  { %81 = vmatpush.msra.mxu0 %v37_v1  ;;  %v1045_v7 = vld [vmem:[%s1245_s3] sm:$0xff]  ;;  %884 = vmatpush.msra.mxu3 %v37_v1 }
   0x5   :  { %133 = vmatpush.msra.mxu1 %v1028_v3 }
   0x6   :  { %12 = vsyncpa [#allocation3], 0  ;;  %82 = vmatpush.msra.mxu0 %v36_v4  ;;  %v27_v8 = vld [vmem:[%s1242_s0] sm:$0xff]  ;;  %vm43_vm0 = vcmask 261120   ;;  %885 = vmatpush.msra.mxu3 %v36_v4  ;;  %v968_v9 = vmov 0.0   ;;  %v1066_v15 = vld [vmem:[%s1246_s4 + $0x18] sm:$0xff] }
   0x7   :  { %134 = vmatpush.msra.mxu1 %v1036_v5  ;;  %v1060_v10 = vld [vmem:[%s1244_s2] ss:$0 sm:$0xff]  ;;  %v1071_v16 = vld [vmem:[%s1246_s4 + $0x10] sm:$0xff]  ;;  %178 = vmatpush.msra.mxu2 %v1066_v15  ;;  %v1078_v18 = vld [vmem:[%s1246_s4 + $0x8] sm:$0xff]  ;;  %s970_s26 = smov 64   ;;  %s971_s8 = smov 32  }
   0x8   :  { %83 = vmatpush.msra.mxu0 %v35_v6  ;;  %886 = vmatpush.msra.mxu3 %v35_v6  ;;  %v1085_v19 = vld [vmem:[%s1246_s4] sm:$0xff]  ;;  %s969_s4 = smov 96   ;;  %v34_v35 = vld [vmem:[%s1242_s0 + $0x38] sm:$0xff]  ;;  %v28_v39 = vld [vmem:[%s1242_s0 + $0x8] sm:$0xff]  ;;  %s972_s25 = smov [#allocation2]  }
   0x9   :  { %135 = vmatpush.msra.mxu1 %v1045_v7  ;;  %851 = vmatmul.msk.f32.vlgmr.msra.gmra.mxu0 %vm43_vm0, %v27_v8  ;;  %s842_s28 = sshll.u32 %s1249_s7, 4  ;;  %s843_s28 = int_to_ptr.hbm [resolvable:$true] %s842_s28 }
   0xa   :  { %136 = vmatmul.f32.vlgmr.msra.gmra.mxu1 %v968_v9  ;;  %215 = vmatpush.msrb.mxu3 %v1022_v2 }
   0xb   :  { %264 = vmatpush.msrb.mxu1 %v1066_v15  ;;  %179 = vmatpush.msra.mxu2 %v1071_v16 }
   0xc   :  { %216 = vmatpush.msrb.mxu3 %v1028_v3 }
   0xd   :  { %265 = vmatpush.msrb.mxu1 %v1071_v16  ;;  %180 = vmatpush.msra.mxu2 %v1078_v18 }
   0xe   :  { %217 = vmatpush.msrb.mxu3 %v1036_v5 }
   0xf   :  { %266 = vmatpush.msrb.mxu1 %v1078_v18  ;;  %181 = vmatpush.msra.mxu2 %v1085_v19 }
  0x10   :  { %218 = vmatpush.msrb.mxu3 %v1045_v7 }
  0x11   :  { %267 = vmatpush.msrb.mxu1 %v1085_v19  ;;  %301 = vmatpush.msrb.mxu2 %v1022_v2 }
  0x12   :  { %858 = vmatmul.msk.f32.vlgmr.msra.gmra.mxu3 %vm43_vm0, %v34_v35  ;;  %852 = vmatmul.msk.f32.gmra.mxu0 %vm43_vm0, %v28_v39 }
  0x13   :  { %387 = vmatpush.msra.mxu1 %v1022_v2  ;;  %302 = vmatpush.msrb.mxu2 %v1028_v3 }
  0x14   :  { %350 = vmatpush.msra.mxu3 %v1066_v15 }
  0x15   :  { %388 = vmatpush.msra.mxu1 %v1028_v3  ;;  %303 = vmatpush.msrb.mxu2 %v1036_v5 }
  0x16   :  { %351 = vmatpush.msra.mxu3 %v1071_v16 }
  0x17   :  { %389 = vmatpush.msra.mxu1 %v1036_v5  ;;  %304 = vmatpush.msrb.mxu2 %v1045_v7 }
  0x18   :  { %352 = vmatpush.msra.mxu3 %v1078_v18 }
  0x19   :  { %390 = vmatpush.msra.mxu1 %v1045_v7 }
  0x1a   :  { %353 = vmatpush.msra.mxu3 %v1085_v19 }
  0x86   :  { %v85_v11 = vpop.f32.mrf.mxu0 }
  0x87   :  { %v137_v12 = vpop.f32.mrf.mxu1  ;;  %v86_v13 = vadd.f32 %v1060_v10, %v85_v11  ;;  %v29_v11 = vld [vmem:[%s1242_s0 + $0x10] sm:$0xff] }
  0x88   :  { %853 = vmatmul.msk.f32.gmra.mxu0 %vm43_vm0, %v29_v11 }
  0x89   :  { %v140_v14 = vadd.f32 %v137_v12, %v86_v13 }
  0x8b   :  { %v859_v17 = vmul.f32 -1.442695, %v140_v14 }
  0x8d   :  { %894 = vpow2.f32 %v859_v17 }
  0x8f   :  { %v88_v46 = vpop.f32.mrf.mxu0 }
  0x90   :  { %v89_v47 = vadd.f32 %v1060_v10, %v88_v46  ;;  %v30_v46 = vld [vmem:[%s1242_s0 + $0x18] sm:$0xff] }
  0x91   :  { %854 = vmatmul.msk.f32.gmra.mxu0 %vm43_vm0, %v30_v46 }
  0x93   :  { %v895_v20 = vpop.eup %894 }
  0x94   :  { %v144_v21 = vadd.f32 1.0, %v895_v20 }
  0x95   :  { %v1125_v45 = vpop.f32.mrf.mxu3 }
  0x96   :  { %896 = vrcp.f32 %v144_v21  ;;  %v156_v25 = vand.u32 2147483648, %v144_v21  ;;  %v154_v27 = vand.u32 2147483647, %v144_v21  ;;  %vm150_vm2 = vweird.f32 %v144_v21 }
  0x98   :  { %v157_v29 = vor.u32 1.1754944e-38, %v156_v25  ;;  %vm155_vm4 = vcmp.eq.f32.partialorder %v154_v27, 8.507059e+37 }
  0x9c   :  { %v897_v22 = vpop.eup %896 }
  0x9d   :  { %v146_v23 = vmul.f32 %v897_v22, %v144_v21  ;;  %vm151_vm1 = vweird.f32 %v897_v22 }
  0x9e   :  { %vm152_vm3 = vmor %vm150_vm2, %vm151_vm1 }
  0x9f   :  { %v147_v24 = vsub.f32 1.0, %v146_v23 }
  0xa1   :  { %v148_v26 = vmul.f32 %v897_v22, %v147_v24 }
  0xa3   :  { %v149_v28 = vadd.f32 %v897_v22, %v148_v26 }
  0xa5   :  { %v153_v30 = vsel %vm152_vm3, %v897_v22, %v149_v28 }
  0xa6   :  { %v158_v31 = vsel %vm155_vm4, %v157_v29, %v153_v30 }
  0xa7   :  { %v160_v32 = vmul.f32 0.0, %v158_v31  ;;  %v192_v40 = vsub.f32 1.0, %v158_v31 }
  0xa9   :  { %162 = vrot.lane.b32.xlu0 %v160_v32, %s969_s4  ;;  %v193_v42 = vmul.f32 0.0, %v192_v40 }
 0x105   :  { %v91_v21 = vpop.f32.mrf.mxu0 }
 0x106   :  { %v92_v22 = vadd.f32 %v1060_v10, %v91_v21  ;;  %v31_v21 = vld [vmem:[%s1242_s0 + $0x20] sm:$0xff] }
 0x107   :  { %855 = vmatmul.msk.f32.gmra.mxu0 %vm43_vm0, %v31_v21 }
 0x11b   :  { %v163_v33 = vpop.permute.xlu0 %162 }
 0x11c   :  { %860 = vmatmul.msk.f32.vlgmr.msra.gmra.mxu2 %vm43_vm0, %v163_v33 }
 0x11d   :  { %436 = vmatpush.msra.mxu2 %v1066_v15 }
 0x11f   :  { %437 = vmatpush.msra.mxu2 %v1071_v16 }
 0x121   :  { %438 = vmatpush.msra.mxu2 %v1078_v18 }
 0x123   :  { %439 = vmatpush.msra.mxu2 %v1085_v19 }
 0x19f   :  { %v183_v34 = vpop.f32.mrf.mxu2 }
 0x1a0   :  { %187 = vrot.lane.b32.xlu0 %v183_v34, %s970_s26 }
 0x212   :  { %v188_v36 = vpop.permute.xlu0 %187 }
 0x213   :  { %v190_v37 = vadd.f32 %v188_v36, %v86_v13 }
 0x215   :  { %898 = vtanh.f32 %v190_v37 }
 0x21b   :  { %v899_v38 = vpop.eup %898 }
 0x21c   :  { %195 = vrot.lane.b32.xlu1 %v899_v38, %s970_s26 }
 0x28e   :  { %v196_v41 = vpop.permute.xlu1 %195 }
 0x28f   :  { %v198_v43 = vmul.f32 %v196_v41, %v158_v31 }
 0x291   :  { %v199_v44 = vadd.f32 %v198_v43, %v193_v42 }
 0x293   :  { %243 = vrot.lane.b32.xlu1 %v199_v44, %s971_s8  ;;  %861 = vmatmul.msk.f32.vlgmr.msrb.gmra.mxu3 %vm43_vm0, %v199_v44 }
 0x294   :  { %473 = vmatpush.msrb.mxu3 %v1022_v2 }
 0x296   :  { %474 = vmatpush.msrb.mxu3 %v1028_v3 }
 0x298   :  { %475 = vmatpush.msrb.mxu3 %v1036_v5 }
 0x29a   :  { %476 = vmatpush.msrb.mxu3 %v1045_v7 }
 0x305   :  { %v244_v62 = vpop.permute.xlu1 %243 }
 0x316   :  { %v220_v48 = vpop.f32.mrf.mxu3 }
 0x317   :  { %v223_v49 = vadd.f32 %v220_v48, %v89_v47 }
 0x319   :  { %v862_v50 = vmul.f32 -1.442695, %v223_v49 }
 0x31b   :  { %900 = vpow2.f32 %v862_v50 }
 0x321   :  { %v901_v51 = vpop.eup %900 }
 0x322   :  { %v227_v52 = vadd.f32 1.0, %v901_v51 }
 0x324   :  { %902 = vrcp.f32 %v227_v52  ;;  %v239_v56 = vand.u32 2147483648, %v227_v52  ;;  %v237_v58 = vand.u32 2147483647, %v227_v52  ;;  %vm233_vm6 = vweird.f32 %v227_v52 }
 0x326   :  { %v240_v60 = vor.u32 1.1754944e-38, %v239_v56  ;;  %vm238_vm8 = vcmp.eq.f32.partialorder %v237_v58, 8.507059e+37 }
 0x32a   :  { %v903_v53 = vpop.eup %902 }
 0x32b   :  { %v229_v54 = vmul.f32 %v903_v53, %v227_v52  ;;  %vm234_vm5 = vweird.f32 %v903_v53  ;;  %v94_v52 = vpop.f32.mrf.mxu0 }
 0x32c   :  { %vm235_vm7 = vmor %vm233_vm6, %vm234_vm5 }
 0x32d   :  { %v230_v55 = vsub.f32 1.0, %v229_v54 }
 0x32f   :  { %v231_v57 = vmul.f32 %v903_v53, %v230_v55 }
 0x331   :  { %v232_v59 = vadd.f32 %v903_v53, %v231_v57 }
 0x333   :  { %v236_v61 = vsel %vm235_vm7, %v903_v53, %v232_v59  ;;  %v95_v53 = vadd.f32 %v1060_v10, %v94_v52 }
 0x334   :  { %v241_v63 = vsel %vm238_vm8, %v240_v60, %v236_v61 }
 0x335   :  { %v246_v0 = vmul.f32 %v244_v62, %v241_v63  ;;  %v278_v12 = vsub.f32 1.0, %v241_v63 }
 0x337   :  { %248 = vrot.lane.b32.xlu2 %v246_v0, %s969_s4  ;;  %v279_v14 = vmul.f32 %v278_v12, %v199_v44 }
 0x391   :  { %v249_v1 = vpop.permute.xlu2 %248 }
 0x392   :  { %863 = vmatmul.msk.f32.vlgmr.msrb.gmra.mxu1 %vm43_vm0, %v249_v1 }
 0x393   :  { %522 = vmatpush.msrb.mxu1 %v1066_v15 }
 0x395   :  { %523 = vmatpush.msrb.mxu1 %v1071_v16 }
 0x397   :  { %524 = vmatpush.msrb.mxu1 %v1078_v18 }
 0x399   :  { %525 = vmatpush.msrb.mxu1 %v1085_v19 }
 0x40f   :  { %v269_v4 = vpop.f32.mrf.mxu1 }
 0x410   :  { %273 = vrot.lane.b32.xlu2 %v269_v4, %s970_s26 }
 0x46a   :  { %v274_v6 = vpop.permute.xlu2 %273 }
 0x46b   :  { %v276_v8 = vadd.f32 %v274_v6, %v89_v47 }
 0x46d   :  { %904 = vtanh.f32 %v276_v8 }
 0x473   :  { %v905_v9 = vpop.eup %904 }
 0x474   :  { %281 = vrot.lane.b32.xlu0 %v905_v9, %s970_s26 }
 0x4e6   :  { %v282_v13 = vpop.permute.xlu0 %281 }
 0x4e7   :  { %v284_v17 = vmul.f32 %v282_v13, %v241_v63 }
 0x4e9   :  { %v285_v20 = vadd.f32 %v284_v17, %v279_v14 }
 0x4eb   :  { %329 = vrot.lane.b32.xlu1 %v285_v20, %s971_s8  ;;  %864 = vmatmul.msk.f32.vlgmr.msrb.gmra.mxu2 %vm43_vm0, %v285_v20 }
 0x4ec   :  { %559 = vmatpush.msrb.mxu2 %v1022_v2 }
 0x4ee   :  { %560 = vmatpush.msrb.mxu2 %v1028_v3 }
 0x4f0   :  { %561 = vmatpush.msrb.mxu2 %v1036_v5 }
 0x4f2   :  { %562 = vmatpush.msrb.mxu2 %v1045_v7 }
 0x55d   :  { %v330_v37 = vpop.permute.xlu1 %329 }
 0x56e   :  { %v306_v23 = vpop.f32.mrf.mxu2 }
 0x56f   :  { %v309_v24 = vadd.f32 %v306_v23, %v92_v22 }
 0x571   :  { %v865_v25 = vmul.f32 -1.442695, %v309_v24 }
 0x573   :  { %906 = vpow2.f32 %v865_v25 }
 0x579   :  { %v907_v26 = vpop.eup %906 }
 0x57a   :  { %v313_v27 = vadd.f32 1.0, %v907_v26 }
 0x57c   :  { %908 = vrcp.f32 %v313_v27  ;;  %v325_v31 = vand.u32 2147483648, %v313_v27  ;;  %v323_v33 = vand.u32 2147483647, %v313_v27  ;;  %vm319_vm10 = vweird.f32 %v313_v27 }
 0x57e   :  { %v326_v35 = vor.u32 1.1754944e-38, %v325_v31  ;;  %vm324_vm12 = vcmp.eq.f32.partialorder %v323_v33, 8.507059e+37 }
 0x582   :  { %v909_v28 = vpop.eup %908 }
 0x583   :  { %v315_v29 = vmul.f32 %v909_v28, %v313_v27  ;;  %vm320_vm9 = vweird.f32 %v909_v28  ;;  %v97_v27 = vpop.f32.mrf.mxu0 }
 0x584   :  { %vm321_vm11 = vmor %vm319_vm10, %vm320_vm9 }
 0x585   :  { %v316_v30 = vsub.f32 1.0, %v315_v29 }
 0x587   :  { %v317_v32 = vmul.f32 %v909_v28, %v316_v30 }
 0x589   :  { %v318_v34 = vadd.f32 %v909_v28, %v317_v32 }
 0x58b   :  { %v322_v36 = vsel %vm321_vm11, %v909_v28, %v318_v34  ;;  %v98_v28 = vadd.f32 %v1060_v10, %v97_v27 }
 0x58c   :  { %v327_v38 = vsel %vm324_vm12, %v326_v35, %v322_v36 }
 0x58d   :  { %v332_v39 = vmul.f32 %v330_v37, %v327_v38  ;;  %v364_v47 = vsub.f32 1.0, %v327_v38 }
 0x58f   :  { %334 = vrot.lane.b32.xlu2 %v332_v39, %s969_s4  ;;  %v365_v49 = vmul.f32 %v364_v47, %v285_v20 }
 0x5e9   :  { %v335_v40 = vpop.permute.xlu2 %334 }
 0x5ea   :  { %866 = vmatmul.msk.f32.vlgmr.msra.gmra.mxu3 %vm43_vm0, %v335_v40 }
 0x5eb   :  { %608 = vmatpush.msra.mxu3 %v1066_v15 }
 0x5ed   :  { %609 = vmatpush.msra.mxu3 %v1071_v16 }
 0x5ef   :  { %610 = vmatpush.msra.mxu3 %v1078_v18 }
 0x5f1   :  { %611 = vmatpush.msra.mxu3 %v1085_v19 }
 0x66d   :  { %v355_v41 = vpop.f32.mrf.mxu3 }
 0x66e   :  { %359 = vrot.lane.b32.xlu0 %v355_v41, %s970_s26 }
 0x6e0   :  { %v360_v42 = vpop.permute.xlu0 %359 }
 0x6e1   :  { %v362_v43 = vadd.f32 %v360_v42, %v92_v22 }
 0x6e3   :  { %910 = vtanh.f32 %v362_v43 }
 0x6e9   :  { %v911_v44 = vpop.eup %910 }
 0x6ea   :  { %367 = vrot.lane.b32.xlu1 %v911_v44, %s970_s26 }
 0x75c   :  { %v368_v48 = vpop.permute.xlu1 %367 }
 0x75d   :  { %v370_v50 = vmul.f32 %v368_v48, %v327_v38  ;;  %v32_v48 = vld [vmem:[%s1242_s0 + $0x28] sm:$0xff] }
 0x75e   :  { %856 = vmatmul.msk.f32.gmra.mxu0 %vm43_vm0, %v32_v48 }
 0x75f   :  { %v371_v51 = vadd.f32 %v370_v50, %v365_v49 }
 0x761   :  { %415 = vrot.lane.b32.xlu2 %v371_v51, %s971_s8  ;;  %867 = vmatmul.msk.f32.vlgmr.msra.gmra.mxu1 %vm43_vm0, %v371_v51 }
 0x762   :  { %645 = vmatpush.msra.mxu1 %v1022_v2 }
 0x764   :  { %646 = vmatpush.msra.mxu1 %v1028_v3 }
 0x766   :  { %647 = vmatpush.msra.mxu1 %v1036_v5 }
 0x768   :  { %648 = vmatpush.msra.mxu1 %v1045_v7 }
 0x7bb   :  { %v416_v8 = vpop.permute.xlu2 %415 }
 0x7db   :  { %v100_v50 = vpop.f32.mrf.mxu0 }
 0x7de   :  { %v392_v54 = vpop.f32.mrf.mxu1 }
 0x7df   :  { %v395_v55 = vadd.f32 %v392_v54, %v95_v53 }
 0x7e1   :  { %v868_v56 = vmul.f32 -1.442695, %v395_v55 }
 0x7e3   :  { %912 = vpow2.f32 %v868_v56 }
 0x7e9   :  { %v913_v57 = vpop.eup %912 }
 0x7ea   :  { %v399_v58 = vadd.f32 1.0, %v913_v57 }
 0x7ec   :  { %914 = vrcp.f32 %v399_v58  ;;  %v411_v62 = vand.u32 2147483648, %v399_v58  ;;  %v409_v0 = vand.u32 2147483647, %v399_v58  ;;  %vm405_vm14 = vweird.f32 %v399_v58 }
 0x7ee   :  { %v412_v4 = vor.u32 1.1754944e-38, %v411_v62  ;;  %vm410_vm1 = vcmp.eq.f32.partialorder %v409_v0, 8.507059e+37 }
 0x7f2   :  { %v915_v59 = vpop.eup %914 }
 0x7f3   :  { %v401_v60 = vmul.f32 %v915_v59, %v399_v58  ;;  %vm406_vm13 = vweird.f32 %v915_v59 }
 0x7f4   :  { %vm407_vm15 = vmor %vm405_vm14, %vm406_vm13 }
 0x7f5   :  { %v402_v61 = vsub.f32 1.0, %v401_v60 }
 0x7f7   :  { %v403_v63 = vmul.f32 %v915_v59, %v402_v61 }
 0x7f9   :  { %v404_v1 = vadd.f32 %v915_v59, %v403_v63 }
 0x7fb   :  { %v408_v6 = vsel %vm407_vm15, %v915_v59, %v404_v1 }
 0x7fc   :  { %v413_v9 = vsel %vm410_vm1, %v412_v4, %v408_v6 }
 0x7fd   :  { %v418_v11 = vmul.f32 %v416_v8, %v413_v9  ;;  %v450_v22 = vsub.f32 1.0, %v413_v9 }
 0x7ff   :  { %420 = vrot.lane.b32.xlu0 %v418_v11, %s969_s4  ;;  %v451_v24 = vmul.f32 %v450_v22, %v371_v51  ;;  %v101_v51 = vadd.f32 %v1060_v10, %v100_v50 }
 0x871   :  { %v421_v12 = vpop.permute.xlu0 %420 }
 0x872   :  { %869 = vmatmul.msk.f32.vlgmr.msra.gmra.mxu2 %vm43_vm0, %v421_v12 }
 0x873   :  { %694 = vmatpush.msra.mxu2 %v1066_v15 }
 0x875   :  { %695 = vmatpush.msra.mxu2 %v1071_v16 }
 0x877   :  { %696 = vmatpush.msra.mxu2 %v1078_v18 }
 0x879   :  { %697 = vmatpush.msra.mxu2 %v1085_v19 }
 0x8f5   :  { %v441_v13 = vpop.f32.mrf.mxu2 }
 0x8f6   :  { %445 = vrot.lane.b32.xlu1 %v441_v13, %s970_s26 }
 0x968   :  { %v446_v14 = vpop.permute.xlu1 %445 }
 0x969   :  { %v448_v17 = vadd.f32 %v446_v14, %v95_v53 }
 0x96b   :  { %916 = vtanh.f32 %v448_v17  ;;  %v33_v17 = vld [vmem:[%s1242_s0 + $0x30] sm:$0xff] }
 0x96c   :  { %857 = vmatmul.msk.f32.gmra.mxu0 %vm43_vm0, %v33_v17 }
 0x971   :  { %v917_v20 = vpop.eup %916 }
 0x972   :  { %453 = vrot.lane.b32.xlu2 %v917_v20, %s970_s26 }
 0x9cc   :  { %v454_v23 = vpop.permute.xlu2 %453 }
 0x9cd   :  { %v456_v25 = vmul.f32 %v454_v23, %v413_v9 }
 0x9cf   :  { %v457_v26 = vadd.f32 %v456_v25, %v451_v24 }
 0x9d1   :  { %501 = vrot.lane.b32.xlu0 %v457_v26, %s971_s8  ;;  %870 = vmatmul.msk.f32.vlgmr.msrb.gmra.mxu3 %vm43_vm0, %v457_v26 }
 0x9d2   :  { %731 = vmatpush.msrb.mxu3 %v1022_v2 }
 0x9d4   :  { %732 = vmatpush.msrb.mxu3 %v1028_v3 }
 0x9d6   :  { %733 = vmatpush.msrb.mxu3 %v1036_v5 }
 0x9d8   :  { %734 = vmatpush.msrb.mxu3 %v1045_v7 }
 0x9e9   :  { %v103_v25 = vpop.f32.mrf.mxu0 }
 0xa43   :  { %v502_v39 = vpop.permute.xlu0 %501 }
 0xa54   :  { %v478_v29 = vpop.f32.mrf.mxu3 }
 0xa55   :  { %v481_v30 = vadd.f32 %v478_v29, %v98_v28 }
 0xa57   :  { %v871_v31 = vmul.f32 -1.442695, %v481_v30 }
 0xa59   :  { %918 = vpow2.f32 %v871_v31 }
 0xa5f   :  { %v919_v32 = vpop.eup %918 }
 0xa60   :  { %v485_v33 = vadd.f32 1.0, %v919_v32 }
 0xa62   :  { %920 = vrcp.f32 %v485_v33  ;;  %v497_v2 = vand.u32 2147483648, %v485_v33  ;;  %v495_v3 = vand.u32 2147483647, %v485_v33  ;;  %vm491_vm3 = vweird.f32 %v485_v33 }
 0xa64   :  { %v498_v7 = vor.u32 1.1754944e-38, %v497_v2  ;;  %vm496_vm5 = vcmp.eq.f32.partialorder %v495_v3, 8.507059e+37 }
 0xa68   :  { %v921_v34 = vpop.eup %920 }
 0xa69   :  { %v487_v35 = vmul.f32 %v921_v34, %v485_v33  ;;  %vm492_vm2 = vweird.f32 %v921_v34 }
 0xa6a   :  { %vm493_vm4 = vmor %vm491_vm3, %vm492_vm2  ;;  %vm833_vm3 = vcmask 64512  }
 0xa6b   :  { %v488_v36 = vsub.f32 1.0, %v487_v35 }
 0xa6d   :  { %v489_v37 = vmul.f32 %v921_v34, %v488_v36 }
 0xa6f   :  { %v490_v5 = vadd.f32 %v921_v34, %v489_v37 }
 0xa71   :  { %v494_v38 = vsel %vm493_vm4, %v921_v34, %v490_v5 }
 0xa72   :  { %v499_v40 = vsel %vm496_vm5, %v498_v7, %v494_v38 }
 0xa73   :  { %v504_v41 = vmul.f32 %v502_v39, %v499_v40 }
 0xa75   :  { %506 = vrot.lane.b32.xlu1 %v504_v41, %s969_s4 }
 0xae7   :  { %v507_v42 = vpop.permute.xlu1 %506 }
 0xae8   :  { %872 = vmatmul.msk.f32.vlgmr.msrb.gmra.mxu1 %vm43_vm0, %v507_v42 }
 0xae9   :  { %780 = vmatpush.msrb.mxu1 %v1066_v15  ;;  %v536_v15 = vsub.f32 1.0, %v499_v40 }
 0xaeb   :  { %781 = vmatpush.msrb.mxu1 %v1071_v16 }
 0xaed   :  { %782 = vmatpush.msrb.mxu1 %v1078_v18  ;;  %v537_v18 = vmul.f32 %v536_v15, %v457_v26  ;;  %v104_v26 = vadd.f32 %v1060_v10, %v103_v25 }
 0xaef   :  { %783 = vmatpush.msrb.mxu1 %v1085_v19 }
 0xb65   :  { %v527_v43 = vpop.f32.mrf.mxu1 }
 0xb66   :  { %531 = vrot.lane.b32.xlu2 %v527_v43, %s970_s26 }
 0xbc0   :  { %v532_v44 = vpop.permute.xlu2 %531 }
 0xbc1   :  { %v534_v46 = vadd.f32 %v532_v44, %v98_v28 }
 0xbc3   :  { %922 = vtanh.f32 %v534_v46 }
 0xbc9   :  { %v923_v47 = vpop.eup %922 }
 0xbca   :  { %539 = vrot.lane.b32.xlu0 %v923_v47, %s970_s26 }
 0xc3c   :  { %v540_v16 = vpop.permute.xlu0 %539 }
 0xc3d   :  { %v542_v49 = vmul.f32 %v540_v16, %v499_v40 }
 0xc3f   :  { %v543_v19 = vadd.f32 %v542_v49, %v537_v18  ;;  %v107_v18 = vadd.f32 %v1060_v10, %v1125_v45 }
 0xc41   :  { %587 = vrot.lane.b32.xlu1 %v543_v19, %s971_s8  ;;  %873 = vmatmul.msk.f32.vlgmr.msrb.gmra.mxu2 %vm43_vm0, %v543_v19 }
 0xcb3   :  { %v588_v4 = vpop.permute.xlu1 %587 }
 0xcc4   :  { %v564_v52 = vpop.f32.mrf.mxu2 }
 0xcc5   :  { %v567_v53 = vadd.f32 %v564_v52, %v101_v51 }
 0xcc7   :  { %v874_v54 = vmul.f32 -1.442695, %v567_v53 }
 0xcc9   :  { %924 = vpow2.f32 %v874_v54 }
 0xccf   :  { %v925_v55 = vpop.eup %924 }
 0xcd0   :  { %v571_v56 = vadd.f32 1.0, %v925_v55 }
 0xcd2   :  { %926 = vrcp.f32 %v571_v56  ;;  %v583_v60 = vand.u32 2147483648, %v571_v56  ;;  %v581_v62 = vand.u32 2147483647, %v571_v56  ;;  %vm577_vm7 = vweird.f32 %v571_v56 }
 0xcd4   :  { %v584_v0 = vor.u32 1.1754944e-38, %v583_v60  ;;  %vm582_vm9 = vcmp.eq.f32.partialorder %v581_v62, 8.507059e+37 }
 0xcd8   :  { %v927_v57 = vpop.eup %926 }
 0xcd9   :  { %v573_v58 = vmul.f32 %v927_v57, %v571_v56  ;;  %vm578_vm6 = vweird.f32 %v927_v57 }
 0xcda   :  { %vm579_vm8 = vmor %vm577_vm7, %vm578_vm6 }
 0xcdb   :  { %v574_v59 = vsub.f32 1.0, %v573_v58 }
 0xcdd   :  { %v575_v61 = vmul.f32 %v927_v57, %v574_v59 }
 0xcdf   :  { %v576_v63 = vadd.f32 %v927_v57, %v575_v61 }
 0xce1   :  { %v580_v1 = vsel %vm579_vm8, %v927_v57, %v576_v63 }
 0xce2   :  { %v585_v6 = vsel %vm582_vm9, %v584_v0, %v580_v1  ;;  %v805_v1 = vld [vmem:[%s1247_s5 + $0x18] sm:$0xff] }
 0xce3   :  { %v590_v8 = vmul.f32 %v588_v4, %v585_v6  ;;  %v622_v20 = vsub.f32 1.0, %v585_v6  ;;  %v804_v4 = vld [vmem:[%s1247_s5 + $0x10] sm:$0xff]  ;;  %825 = vmatpush.msrb.mxu2 %v805_v1 }
 0xce5   :  { %592 = vrot.lane.b32.xlu2 %v590_v8, %s969_s4  ;;  %v623_v22 = vmul.f32 %v622_v20, %v543_v19  ;;  %826 = vmatpush.msrb.mxu2 %v804_v4 }
 0xd3f   :  { %v593_v9 = vpop.permute.xlu2 %592 }
 0xd40   :  { %875 = vmatmul.msk.f32.vlgmr.msra.gmra.mxu3 %vm43_vm0, %v593_v9 }
 0xdc3   :  { %v613_v11 = vpop.f32.mrf.mxu3 }
 0xdc4   :  { %617 = vrot.lane.b32.xlu0 %v613_v11, %s970_s26  ;;  %v803_v11 = vld [vmem:[%s1247_s5 + $0x8] sm:$0xff] }
 0xdc5   :  { %827 = vmatpush.msrb.mxu2 %v803_v11 }
 0xe36   :  { %v618_v12 = vpop.permute.xlu0 %617 }
 0xe37   :  { %v620_v13 = vadd.f32 %v618_v12, %v101_v51  ;;  %v802_v12 = vld [vmem:[%s1247_s5] sm:$0xff] }
 0xe38   :  { %828 = vmatpush.msrb.mxu2 %v802_v12 }
 0xe39   :  { %928 = vtanh.f32 %v620_v13 }
 0xe3f   :  { %v929_v14 = vpop.eup %928 }
 0xe40   :  { %625 = vrot.lane.b32.xlu1 %v929_v14, %s970_s26 }
 0xeb2   :  { %v626_v21 = vpop.permute.xlu1 %625 }
 0xeb3   :  { %v628_v23 = vmul.f32 %v626_v21, %v585_v6 }
 0xeb5   :  { %v629_v24 = vadd.f32 %v628_v23, %v623_v22  ;;  %v893_v22 = vld [vmem:[%s1248_s6] ss:$0 sm:$0xff] }
 0xeb7   :  { %673 = vrot.lane.b32.xlu2 %v629_v24, %s971_s8  ;;  %876 = vmatmul.msk.f32.vlgmr.msra.gmra.mxu1 %vm43_vm0, %v629_v24 }
 0xf11   :  { %v674_v7 = vpop.permute.xlu2 %673 }
 0xf34   :  { %v650_v27 = vpop.f32.mrf.mxu1 }
 0xf35   :  { %v653_v28 = vadd.f32 %v650_v27, %v104_v26 }
 0xf37   :  { %v877_v29 = vmul.f32 -1.442695, %v653_v28 }
 0xf39   :  { %930 = vpow2.f32 %v877_v29 }
 0xf3f   :  { %v931_v30 = vpop.eup %930 }
 0xf40   :  { %v657_v31 = vadd.f32 1.0, %v931_v30 }
 0xf42   :  { %932 = vrcp.f32 %v657_v31  ;;  %v669_v35 = vand.u32 2147483648, %v657_v31  ;;  %v667_v2 = vand.u32 2147483647, %v657_v31  ;;  %vm663_vm11 = vweird.f32 %v657_v31 }
 0xf44   :  { %v670_v3 = vor.u32 1.1754944e-38, %v669_v35  ;;  %vm668_vm13 = vcmp.eq.f32.partialorder %v667_v2, 8.507059e+37 }
 0xf48   :  { %v933_v32 = vpop.eup %932 }
 0xf49   :  { %v659_v33 = vmul.f32 %v933_v32, %v657_v31  ;;  %vm664_vm10 = vweird.f32 %v933_v32 }
 0xf4a   :  { %vm665_vm12 = vmor %vm663_vm11, %vm664_vm10 }
 0xf4b   :  { %v660_v34 = vsub.f32 1.0, %v659_v33 }
 0xf4d   :  { %v661_v36 = vmul.f32 %v933_v32, %v660_v34 }
 0xf4f   :  { %v662_v37 = vadd.f32 %v933_v32, %v661_v36 }
 0xf51   :  { %v666_v5 = vsel %vm665_vm12, %v933_v32, %v662_v37 }
 0xf52   :  { %v671_v38 = vsel %vm668_vm13, %v670_v3, %v666_v5 }
 0xf53   :  { %v676_v39 = vmul.f32 %v674_v7, %v671_v38  ;;  %v708_v46 = vsub.f32 1.0, %v671_v38 }
 0xf55   :  { %678 = vrot.lane.b32.xlu0 %v676_v39, %s969_s4  ;;  %v709_v48 = vmul.f32 %v708_v46, %v629_v24 }
 0xfc7   :  { %v679_v40 = vpop.permute.xlu0 %678 }
 0xfc8   :  { %878 = vmatmul.msk.f32.vlgmr.msra.gmra.mxu2 %vm43_vm0, %v679_v40 }
0x104b   :  { %v699_v41 = vpop.f32.mrf.mxu2 }
0x104c   :  { %703 = vrot.lane.b32.xlu1 %v699_v41, %s970_s26 }
0x10be   :  { %v704_v42 = vpop.permute.xlu1 %703 }
0x10bf   :  { %v706_v43 = vadd.f32 %v704_v42, %v104_v26 }
0x10c1   :  { %934 = vtanh.f32 %v706_v43 }
0x10c7   :  { %v935_v44 = vpop.eup %934 }
0x10c8   :  { %711 = vrot.lane.b32.xlu2 %v935_v44, %s970_s26 }
0x1122   :  { %v712_v47 = vpop.permute.xlu2 %711 }
0x1123   :  { %v714_v15 = vmul.f32 %v712_v47, %v671_v38 }
0x1125   :  { %v715_v16 = vadd.f32 %v714_v15, %v709_v48 }
0x1127   :  { %759 = vrot.lane.b32.xlu0 %v715_v16, %s971_s8  ;;  %879 = vmatmul.msk.f32.vlgmr.msrb.gmra.mxu3 %vm43_vm0, %v715_v16 }
0x1199   :  { %v760_v10 = vpop.permute.xlu0 %759 }
0x11aa   :  { %v736_v49 = vpop.f32.mrf.mxu3 }
0x11ab   :  { %v739_v19 = vadd.f32 %v736_v49, %v107_v18 }
0x11ad   :  { %v880_v50 = vmul.f32 -1.442695, %v739_v19 }
0x11af   :  { %936 = vpow2.f32 %v880_v50 }
0x11b5   :  { %v937_v51 = vpop.eup %936 }
0x11b6   :  { %v743_v52 = vadd.f32 1.0, %v937_v51 }
0x11b8   :  { %938 = vrcp.f32 %v743_v52  ;;  %v755_v56 = vand.u32 2147483648, %v743_v52  ;;  %v753_v58 = vand.u32 2147483647, %v743_v52  ;;  %vm749_vm15 = vweird.f32 %v743_v52 }
0x11ba   :  { %v756_v60 = vor.u32 1.1754944e-38, %v755_v56  ;;  %vm754_vm2 = vcmp.eq.f32.partialorder %v753_v58, 8.507059e+37 }
0x11be   :  { %v939_v53 = vpop.eup %938 }
0x11bf   :  { %v745_v54 = vmul.f32 %v939_v53, %v743_v52  ;;  %vm750_vm14 = vweird.f32 %v939_v53 }
0x11c0   :  { %vm751_vm1 = vmor %vm749_vm15, %vm750_vm14 }
0x11c1   :  { %v746_v55 = vsub.f32 1.0, %v745_v54 }
0x11c3   :  { %v747_v57 = vmul.f32 %v939_v53, %v746_v55 }
0x11c5   :  { %v748_v59 = vadd.f32 %v939_v53, %v747_v57 }
0x11c7   :  { %v752_v61 = vsel %vm751_vm1, %v939_v53, %v748_v59 }
0x11c8   :  { %v757_v45 = vsel %vm754_vm2, %v756_v60, %v752_v61 }
0x11c9   :  { %v762_v62 = vmul.f32 %v760_v10, %v757_v45  ;;  %v794_v13 = vsub.f32 1.0, %v757_v45 }
0x11cb   :  { %764 = vrot.lane.b32.xlu1 %v762_v62, %s969_s4  ;;  %v795_v17 = vmul.f32 %v794_v13, %v715_v16  ;;  %s840_s4 = sshll.u32 %s972_s25, 4  ;;  %s841_s4 = int_to_ptr.vmem [resolvable:$true] %s840_s4 }
0x123d   :  { %v765_v63 = vpop.permute.xlu1 %764 }
0x123e   :  { %881 = vmatmul.msk.f32.vlgmr.msrb.gmra.mxu1 %vm43_vm0, %v765_v63 }
0x12bb   :  { %v785_v0 = vpop.f32.mrf.mxu1 }
0x12bc   :  { %789 = vrot.lane.b32.xlu2 %v785_v0, %s970_s26 }
0x1316   :  { %v790_v6 = vpop.permute.xlu2 %789 }
0x1317   :  { %v792_v8 = vadd.f32 %v790_v6, %v107_v18 }
0x1319   :  { %940 = vtanh.f32 %v792_v8 }
0x131f   :  { %v941_v9 = vpop.eup %940 }
0x1320   :  { %797 = vrot.lane.b32.xlu0 %v941_v9, %s970_s26 }
0x1392   :  { %v798_v14 = vpop.permute.xlu0 %797 }
0x1393   :  { %v800_v20 = vmul.f32 %v798_v14, %v757_v45 }
0x1395   :  { %v801_v21 = vadd.f32 %v800_v20, %v795_v17 }
0x1397   :  { %882 = vmatmul.msk.f32.vlgmr.msrb.gmra.mxu2 %vm43_vm0, %v801_v21 }
0x141a   :  { %v830_v23 = vpop.f32.mrf.mxu2 }
0x141b   :  { %v831_v24 = vadd.f32 %v893_v22, %v830_v23 }
0x141d   :  { %834 = vst.msk [vmem:[#allocation2] sm:$0xff] %vm833_vm3, %v831_v24 }
0x141e   :  { %845 = dma.vmem_to_hbm [thread:$0]  %s841_s4, 128, %s843_s28, [#allocation3]  }
0x141f   :  { %966 = dma.done.wait [#allocation3], 128  }
0x1420   :  { %967 = vsyncadd [#allocation3], 4294967168 }
0x1421   :  { %850 = vsyncpa [#allocation3], 1 }

</bundles_post_ra>
